<compile_context>
chip_gen: v5e
topology: v5e:2x2
jax: 0.10.0
libtpu: 0.0.40
codegen_flags: <defaults>
</compile_context>

<pallas_src>
import functools

import jax
import jax.numpy as jnp
from jax.experimental import pallas as pl
from jax.experimental.pallas import tpu as pltpu


def _matmul_shift_relu_kernel(x_ref, w_ref, shift_ref, o_ref):
    """One im2col matmul tile + folded-BN shift + ReLU.

    x_ref:     (TILE_M, K_pad)    im2col patches (compute dtype)
    w_ref:     (K_pad, TILE_N)    flattened HWIO weights * BN scale
    shift_ref: (1, TILE_N)        beta - running_mean * scale   (f32)
    o_ref:     (TILE_M, TILE_N)   output rows
    """
    acc = jnp.dot(x_ref[...], w_ref[...], preferred_element_type=jnp.float32)
    o_ref[...] = jnp.maximum(acc + shift_ref[...], 0.0).astype(o_ref.dtype)


def _round_up(x, m):
    return ((x + m - 1) // m) * m


@functools.partial(
    jax.jit,
    static_argnames=("padding", "stride", "compute_dtype", "out_dtype"))
def basic_conv2d(x_nchw, w_oihw, gamma, beta, run_mean, run_var,
                 eps: float = 1e-5, padding: int = 1, stride: int = 1,
                 compute_dtype=jnp.bfloat16, out_dtype=jnp.float32):
    """Pallas-backed BasicConv2d forward. Returns NCHW output (out_dtype)."""
    N, Cin, H, W = x_nchw.shape
    Cout, _, kH, kW = w_oihw.shape

    # ---- layout glue (plain JAX): NCHW -> NHWC, spatial pad, im2col --------
    # allow_input_fusion below lets XLA fold this producer chain into the
    # pallas operand instead of writing the kH*kW-x-larger patches to HBM.
    x_nhwc = jnp.transpose(x_nchw, (0, 2, 3, 1))
    x_pad = jnp.pad(
        x_nhwc, ((0, 0), (padding, padding), (padding, padding), (0, 0)))
    Hp, Wp = H + 2 * padding, W + 2 * padding
    Ho = (Hp - kH) // stride + 1
    Wo = (Wp - kW) // stride + 1

    # im2col patches; tap order (kh, kw, cin) matches the HWIO weight reshape.
    taps = []
    for kh in range(kH):
        for kw in range(kW):
            taps.append(x_pad[:, kh: kh + (Ho - 1) * stride + 1: stride,
                              kw: kw + (Wo - 1) * stride + 1: stride, :])
    patches = jnp.concatenate(taps, axis=-1)                  # (N, Ho, Wo, K)
    K = kH * kW * Cin
    M = N * Ho * Wo
    lhs = patches.reshape(M, K)

    # ---- fold eval-mode BN into weights / shift ----------------------------
    scale = gamma / jnp.sqrt(run_var + eps)                   # (Cout,)
    shift = beta - run_mean * scale                           # (Cout,)
    w_2d = jnp.transpose(w_oihw, (2, 3, 1, 0)).reshape(K, Cout)  # HWIO, flat K
    w_2d = w_2d * scale[None, :]                              # fold BN scale

    # ---- pad to lane/sublane friendly shapes & pick tiles ------------------
    lhs_itemsize = jnp.dtype(compute_dtype).itemsize
    out_itemsize = jnp.dtype(out_dtype).itemsize
    # bf16 minimum sublane tile is (16, 128); f32 is (8, 128).
    min_tile_m = 16 if lhs_itemsize < 4 else 8

    K_pad = _round_up(K, 128)
    # 256-wide N fills the v6e/v7x 2x256x256 MXU; stay at 128 for tiny Cout.
    Cout_pad = _round_up(Cout, 256) if Cout >= 96 else _round_up(Cout, 128)
    TILE_N = min(Cout_pad, 256)
    grid_n = Cout_pad // TILE_N

    VMEM_BUDGET = 36 * 1024 * 1024          # headroom inside v7x's 64 MiB
    TILE_M = 512
    while TILE_M > min_tile_m:
        footprint = (2 * TILE_M * K_pad * lhs_itemsize        # lhs, dbl-buffered
                     + 2 * TILE_M * TILE_N * out_itemsize     # out, dbl-buffered
                     + 2 * K_pad * TILE_N * lhs_itemsize      # weights (<=2 bufs)
                     + 2 * TILE_N * 4)                        # shift
        fits = footprint <= VMEM_BUDGET
        two_tiles = (M + TILE_M - 1) // TILE_M >= 2           # feed both v7x TCs
        if fits and two_tiles:
            break
        TILE_M //= 2
    TILE_M = max(TILE_M, min_tile_m)
    M_pad = _round_up(M, TILE_M)
    grid_m = M_pad // TILE_M

    lhs_p = jnp.pad(lhs, ((0, M_pad - M), (0, K_pad - K))).astype(compute_dtype)
    rhs_p = jnp.pad(w_2d, ((0, K_pad - K),
                           (0, Cout_pad - Cout))).astype(compute_dtype)
    shift_p = jnp.pad(shift, (0, Cout_pad - Cout)).reshape(
        1, Cout_pad).astype(jnp.float32)

    # Weight / shift blocks are grid-invariant when grid_n == 1: keep a single
    # VMEM copy instead of the default double buffer.
    const_pipe = pl.Buffered(1) if grid_n == 1 else None

    cost = pl.CostEstimate(
        flops=2 * M_pad * K_pad * Cout_pad,
        transcendentals=0,
        bytes_accessed=(M_pad * K_pad * lhs_itemsize
                        + K_pad * Cout_pad * lhs_itemsize
                        + Cout_pad * 4
                        + M_pad * Cout_pad * out_itemsize))

    out2d = pl.pallas_call(
        _matmul_shift_relu_kernel,
        out_shape=jax.ShapeDtypeStruct((M_pad, Cout_pad), out_dtype),
        grid=(grid_m, grid_n),
        in_specs=[
            pl.BlockSpec((TILE_M, K_pad), lambda i, j: (i, 0)),
            pl.BlockSpec((K_pad, TILE_N), lambda i, j: (0, j),
                         pipeline_mode=const_pipe),
            pl.BlockSpec((1, TILE_N), lambda i, j: (0, j),
                         pipeline_mode=const_pipe),
        ],
        out_specs=pl.BlockSpec((TILE_M, TILE_N), lambda i, j: (i, j)),
        compiler_params=pltpu.CompilerParams(
            dimension_semantics=("parallel", "parallel"),
            vmem_limit_bytes=48 * 1024 * 1024,
            allow_input_fusion=[True, False, False]),
        cost_estimate=cost,
    )(lhs_p, rhs_p, shift_p)

    out_nhwc = out2d[:M, :Cout].reshape(N, Ho, Wo, Cout)
    # Kept for PyTorch NCHW parity; drop both transposes (stay NHWC and bf16
    # end-to-end) if the downstream consumer allows it — saves two HBM passes.
    return jnp.transpose(out_nhwc, (0, 3, 1, 2)).astype(out_dtype)


def _reference(x_nchw, w_oihw, gamma, beta, run_mean, run_var, eps, padding):
    """Pure-JAX f32 reference for correctness checking."""
    y = jax.lax.conv_general_dilated(
        x_nchw.astype(jnp.float32), w_oihw.astype(jnp.float32),
        window_strides=(1, 1),
        padding=[(padding, padding), (padding, padding)],
        dimension_numbers=("NCHW", "OIHW", "NCHW"))
    scale = gamma / jnp.sqrt(run_var + eps)
    shift = beta - run_mean * scale
    y = y * scale[None, :, None, None] + shift[None, :, None, None]
    return jnp.maximum(y, 0.0)


if __name__ == "__main__":
    key = jax.random.PRNGKey(0)
    k_x, k_w, k_g, k_b, k_m, k_v = jax.random.split(key, 6)

    N, Cin, H, W = 2, 4, 16, 16
    Cout, kH, kW = 8, 3, 3   # BasicConv2d(4, 8, kernel_size=3, padding=1)
    padding = 1
    eps = 1e-5

    x = jax.random.normal(k_x, (N, Cin, H, W), dtype=jnp.float32)
    w = jax.random.normal(k_w, (Cout, Cin, kH, kW), dtype=jnp.float32) * 0.1
    gamma = jax.random.uniform(k_g, (Cout,), minval=0.5, maxval=1.5)
    beta = jax.random.normal(k_b, (Cout,)) * 0.1
    run_mean = jax.random.normal(k_m, (Cout,)) * 0.1
    run_var = jax.random.uniform(k_v, (Cout,), minval=0.5, maxval=1.5)

    ref = _reference(x, w, gamma, beta, run_mean, run_var, eps, padding)

    # Default (fast) path: bf16 MXU operands, f32 accumulation/epilogue.
    out_bf16 = basic_conv2d(x, w, gamma, beta, run_mean, run_var,
                            eps=eps, padding=padding)
    out_bf16 = jax.block_until_ready(out_bf16)
    assert out_bf16.shape == (N, Cout, H, W)
    assert jnp.allclose(out_bf16, ref, atol=5e-2, rtol=5e-2)

    # Exactness path: f32 operands match the f32 reference tightly.
    out_f32 = basic_conv2d(x, w, gamma, beta, run_mean, run_var,
                           eps=eps, padding=padding,
                           compute_dtype=jnp.float32)
    out_f32 = jax.block_until_ready(out_f32)
    assert jnp.allclose(out_f32, ref, atol=1e-4, rtol=1e-4)

    print("KERNEL_OK")
</pallas_src>

<mosaic_0001>
module attributes {stable_mosaic.version = 11 : i64} {
  func.func @_matmul_shift_relu_kernel(%arg0: i32, %arg1: i32, %arg2: memref<256x128xbf16, #tpu.memory_space<vmem>>, %arg3: memref<128x128xbf16, #tpu.memory_space<vmem>>, %arg4: memref<1x128xf32, #tpu.memory_space<vmem>>, %arg5: memref<256x128xf32, #tpu.memory_space<vmem>>) attributes {dimension_semantics = [#tpu.dimension_semantics<parallel>, #tpu.dimension_semantics<parallel>], iteration_bounds = array<i64: 2, 1>, scalar_prefetch = 0 : i64, scratch_operands = 0 : i64, tpu.core_type = #tpu.core_type<tc>, window_params = [{transform_indices = @transform_0, window_bounds = array<i64: 256, 128>}, {pipeline_mode = #tpu.pipeline_mode<synchronous>, transform_indices = @transform_1, window_bounds = array<i64: 128, 128>}, {pipeline_mode = #tpu.pipeline_mode<synchronous>, transform_indices = @transform_2, window_bounds = array<i64: 1, 128>}, {transform_indices = @transform_3, window_bounds = array<i64: 256, 128>}]} {
    %c0 = arith.constant 0 : index
    %c0_0 = arith.constant 0 : index
    %0 = vector.load %arg2[%c0, %c0_0] : memref<256x128xbf16, #tpu.memory_space<vmem>>, vector<256x128xbf16>
    %c0_1 = arith.constant 0 : index
    %c0_2 = arith.constant 0 : index
    %1 = vector.load %arg3[%c0_1, %c0_2] : memref<128x128xbf16, #tpu.memory_space<vmem>>, vector<128x128xbf16>
    %cst = arith.constant dense<0.000000e+00> : vector<256x128xf32>
    %2 = tpu.matmul %0, %1, %cst {dimension_numbers = #tpu.dot_dimension_numbers<[1], [0], [0], [1], [0, 0, 1, 1], [], []>} : vector<256x128xbf16>, vector<128x128xbf16>, vector<256x128xf32> -> vector<256x128xf32>
    %c0_3 = arith.constant 0 : index
    %c0_4 = arith.constant 0 : index
    %3 = vector.load %arg4[%c0_3, %c0_4] : memref<1x128xf32, #tpu.memory_space<vmem>>, vector<1x128xf32>
    %4 = vector.broadcast %3 : vector<1x128xf32> to vector<256x128xf32>
    %5 = arith.addf %2, %4 : vector<256x128xf32>
    %cst_5 = arith.constant 0.000000e+00 : f32
    %6 = vector.broadcast %cst_5 : f32 to vector<256x128xf32>
    %7 = arith.maximumf %5, %6 : vector<256x128xf32>
    %c0_6 = arith.constant 0 : index
    %c0_7 = arith.constant 0 : index
    %8 = vector.load %arg5[%c0_6, %c0_7] : memref<256x128xf32, #tpu.memory_space<vmem>>, vector<256x128xf32>
    tpu.vector_store %arg5[%c0_6, %c0_7], %7 {strides = array<i32>} : memref<256x128xf32, #tpu.memory_space<vmem>>, vector<256x128xf32>,
    return
  }
  func.func @transform_0(%arg0: i32, %arg1: i32) -> (i32, i32) {
    %c0_i32 = arith.constant 0 : i32
    %c0_i32_0 = arith.constant 0 : i32
    return %arg0, %c0_i32 : i32, i32
  }
  func.func @transform_1(%arg0: i32, %arg1: i32) -> (i32, i32) {
    %c0_i32 = arith.constant 0 : i32
    %c0_i32_0 = arith.constant 0 : i32
    return %c0_i32, %arg1 : i32, i32
  }
  func.func @transform_2(%arg0: i32, %arg1: i32) -> (i32, i32) {
    %c0_i32 = arith.constant 0 : i32
    %c0_i32_0 = arith.constant 0 : i32
    return %c0_i32, %arg1 : i32, i32
  }
  func.func @transform_3(%arg0: i32, %arg1: i32) -> (i32, i32) {
    %c0_i32 = arith.constant 0 : i32
    return %arg0, %arg1 : i32, i32
  }
}

</mosaic_0001>

<bundles_post_ra>
// kernel: basic_conv2d.2
= control target key start
LH: loop header
LB: loop body
LE: loop exit
PB: predicated region body
PF: predicated region fallthrough
CT: control target
= control target key end

     0   :  { %s1683_s17 = smov 0   ;;  %s1685_s18 = smov 0   ;;  %s1932_s0 = inlined_call_operand.vmem [shape: bf16[128,128], index: 0, kind: input, shape index: {}]   ;;  %s1933_s1 = inlined_call_operand.vmem [shape: f32[1,128], index: 1, kind: input, shape index: {}]   ;;  %s1934_s2 = inlined_call_operand.vmem [shape: bf16[512,36], index: 2, kind: input, shape index: {}]   ;;  %s1935_s3 = inlined_call_operand.<no memory space> [shape: bf16[], index: 3, kind: input, shape index: {}]   ;;  %s1936_s4 = inlined_call_operand.vmem [shape: f32[512,128], index: 4, kind: output, shape index: {}]  }
   0x1   :  { %v9_v0 = vstv %s1935_s3  ;;  %s1687_s19 = smov 0  }
   0x2   :  { %v1681_v1 = vunpack.i.l.bf16 %v9_v0 }
   0x3 LB: > { %s31_s3 = sadd.s32 1, %s1647_s18  ;;  %p1422_p0 = scmp.ge.s32.totalorder %s1651_s19, 1  ;;  %s1651_s19 = sphi %s1687_s19, %s19_s19   ;;  %s1647_s18 = sphi %s1685_s18, %s1938_s18   ;;  %s1643_s17 = sphi %s1683_s17, %s1937_s17  }
   0x4   : > { %p33_p1 = scmp.ge.s32.totalorder %s31_s3, 2  ;;  %p175_p2 = scmp.lt.s32.totalorder %s1651_s19, 3 }
   0x6   : > { %s1940_s3 = smov (%p33_p1, %s31_s3), 0  ;;  %p176_p3 = pnand %p1422_p0, %p175_p2 }
   0x8   : > { %179 = sbr.rel (%p176_p3) target bundleno = 240 (0xf0), region = 32 }
   0xd   : > { %v1579_v2 = vld [vmem:[%s1932_s0 + $0x38] sm:$0xff]  ;;  %s1423_s22 = sshll.u32 %s1643_s17, 5  ;;  %v243_v3 = vlaneseq  ;;  %v1578_v4 = vld [vmem:[%s1932_s0 + $0x30] sm:$0xff]  ;;  %v1577_v6 = vld [vmem:[%s1932_s0 + $0x28] sm:$0xff] }
   0xe   : > { %p210_p4 = scmp.lt.s32.totalorder %s1423_s22, 63  ;;  %1161 = vmatpush.bf16.msra.mxu0 %v1579_v2  ;;  %1580 = vmatpush.bf16.msra.mxu1 %v1579_v2  ;;  %v1576_v20 = vld [vmem:[%s1932_s0 + $0x20] sm:$0xff]  ;;  %v1575_v38 = vld [vmem:[%s1932_s0 + $0x18] sm:$0xff]  ;;  %v1574_v54 = vld [vmem:[%s1932_s0 + $0x10] sm:$0xff] }
   0xf   : > { %1581 = vmatpush.bf16.msra.mxu2 %v1579_v2  ;;  %1582 = vmatpush.bf16.msra.mxu3 %v1579_v2  ;;  %v1709_v5 = vand.u32 127, %v243_v3 }
  0x10   : > { %s1942_s22 = smov (!%p210_p4, %s1423_s22), 63 }
  0x11   : > { %s1424_s25 = sshll.u32 %s1942_s22, 2  ;;  %vm246_vm0 = vcmp.lt.s32.totalorder %v1709_v5, 36  ;;  %s1426_s17 = sshll.u32 %s1942_s22, 3 }
  0x12   : > { %1162 = vmatpush.bf16.msra.mxu0 %v1578_v4  ;;  %1583 = vmatpush.bf16.msra.mxu1 %v1578_v4  ;;  %s1718_s30 = scalar_lea.vmem %s1934_s2, %s1424_s25  ;;  %s1859_s23 = scalar_lea.vmem %s1936_s4, %s1426_s17 }
  0x13   : > { %1584 = vmatpush.bf16.msra.mxu2 %v1578_v4  ;;  %1585 = vmatpush.bf16.msra.mxu3 %v1578_v4  ;;  %v240_v7 = vld [vmem:[%s1718_s30] sm:$0xff]   ;;  %v1428_v15 = vld [vmem:[%s1718_s30 + $0x8] sm:$0xff]   ;;  %v1430_v57 = vld [vmem:[%s1718_s30 + $0x10] sm:$0xff]  }
  0x14   : > { %v1434_v8 = vld [vmem:[%s1718_s30 + $0x20] sm:$0xff]   ;;  %v241_v10 = vunpack.c.l.bf16 %v240_v7  ;;  %v263_v11 = vunpack.c.h.bf16 %v240_v7  ;;  %v286_v24 = vunpack.c.l.bf16 %v1428_v15  ;;  %v1436_v29 = vld [vmem:[%s1718_s30 + $0x28] sm:$0xff]   ;;  %v309_v41 = vunpack.c.h.bf16 %v1428_v15  ;;  %v1438_v61 = vld [vmem:[%s1718_s30 + $0x30] sm:$0xff]  }
  0x15   : > { %v1442_v9 = vld [vmem:[%s1718_s30 + $0x40] sm:$0xff]   ;;  %v424_v12 = vunpack.c.l.bf16 %v1434_v8  ;;  %v447_v13 = vunpack.c.h.bf16 %v1434_v8  ;;  %v1444_v34 = vld [vmem:[%s1718_s30 + $0x48] sm:$0xff]   ;;  %v470_v42 = vunpack.c.l.bf16 %v1436_v29  ;;  %v493_v44 = vunpack.c.h.bf16 %v1436_v29  ;;  %v1446_v62 = vld [vmem:[%s1718_s30 + $0x50] sm:$0xff]  }
  0x16   : > { %v1450_v14 = vld [vmem:[%s1718_s30 + $0x60] sm:$0xff]   ;;  %v608_v16 = vunpack.c.l.bf16 %v1442_v9  ;;  %v631_v17 = vunpack.c.h.bf16 %v1442_v9  ;;  %1163 = vmatpush.bf16.msra.mxu0 %v1577_v6  ;;  %1586 = vmatpush.bf16.msra.mxu1 %v1577_v6  ;;  %v247_v21 = vsel %vm246_vm0, %v241_v10, %v1681_v1  ;;  %v269_v22 = vsel %vm246_vm0, %v263_v11, %v1681_v1  ;;  %v1452_v37 = vld [vmem:[%s1718_s30 + $0x68] sm:$0xff]   ;;  %v1454_v8 = vld [vmem:[%s1718_s30 + $0x70] sm:$0xff]  }
  0x17   : > { %v792_v18 = vunpack.c.l.bf16 %v1450_v14  ;;  %v815_v19 = vunpack.c.h.bf16 %v1450_v14  ;;  %v430_v23 = vsel %vm246_vm0, %v424_v12, %v1681_v1  ;;  %1587 = vmatpush.bf16.msra.mxu2 %v1577_v6  ;;  %1588 = vmatpush.bf16.msra.mxu3 %v1577_v6  ;;  %v248_v25 = vpack.c.bf16 0.0, %v247_v21  ;;  %v1573_v9 = vld [vmem:[%s1932_s0 + $0x8] sm:$0xff] }
  0x18   : > { %v271_v26 = vpack.c.bf16 0.0, %v269_v22  ;;  %v432_v27 = vpack.c.bf16 0.0, %v430_v23  ;;  %v453_v28 = vsel %vm246_vm0, %v447_v13, %v1681_v1  ;;  %v614_v31 = vsel %vm246_vm0, %v608_v16, %v1681_v1  ;;  %v1572_v22 = vld [vmem:[%s1932_s0] sm:$0xff] }
  0x19   : > { %v455_v30 = vpack.c.bf16 0.0, %v453_v28  ;;  %v637_v32 = vsel %vm246_vm0, %v631_v17, %v1681_v1  ;;  %v798_v33 = vsel %vm246_vm0, %v792_v18, %v1681_v1  ;;  %251 = vst [vmem:[#allocation7] sm:$0xf] %v248_v25  ;;  %v616_v35 = vpack.c.bf16 0.0, %v614_v31 }
  0x1a   : > { %v821_v36 = vsel %vm246_vm0, %v815_v19, %v1681_v1  ;;  %1164 = vmatpush.bf16.msra.mxu0 %v1576_v20  ;;  %1589 = vmatpush.bf16.msra.mxu1 %v1576_v20  ;;  %274 = vst [vmem:[#allocation7 + $0x4] sm:$0xf] %v271_v26  ;;  %v639_v39 = vpack.c.bf16 0.0, %v637_v32  ;;  %v292_v40 = vsel %vm246_vm0, %v286_v24, %v1681_v1  ;;  %v800_v43 = vpack.c.bf16 0.0, %v798_v33 }
  0x1b   : > { %1590 = vmatpush.bf16.msra.mxu2 %v1576_v20  ;;  %1591 = vmatpush.bf16.msra.mxu3 %v1576_v20  ;;  %435 = vst [vmem:[#allocation7 + $0x20] sm:$0xf] %v432_v27  ;;  %v654_v45 = vunpack.c.l.bf16 %v1444_v34  ;;  %v677_v46 = vunpack.c.h.bf16 %v1444_v34  ;;  %v823_v47 = vpack.c.bf16 0.0, %v821_v36  ;;  %v315_v48 = vsel %vm246_vm0, %v309_v41, %v1681_v1  ;;  %v1440_v41 = vld [vmem:[%s1718_s30 + $0x38] sm:$0xff]  }
  0x1c   : > { %458 = vst [vmem:[#allocation7 + $0x24] sm:$0xf] %v455_v30  ;;  %v476_v49 = vsel %vm246_vm0, %v470_v42, %v1681_v1  ;;  %v838_v50 = vunpack.c.l.bf16 %v1452_v37  ;;  %v294_v51 = vpack.c.bf16 0.0, %v292_v40  ;;  %v499_v52 = vsel %vm246_vm0, %v493_v44, %v1681_v1  ;;  %v1448_v42 = vld [vmem:[%s1718_s30 + $0x58] sm:$0xff]  }
  0x1d   : > { %619 = vst [vmem:[#allocation7 + $0x40] sm:$0xf] %v616_v35  ;;  %v861_v53 = vunpack.c.h.bf16 %v1452_v37  ;;  %v317_v55 = vpack.c.bf16 0.0, %v315_v48  ;;  %v660_v56 = vsel %vm246_vm0, %v654_v45, %v1681_v1  ;;  %v478_v58 = vpack.c.bf16 0.0, %v476_v49 }
  0x1e   : > { %1165 = vmatpush.bf16.msra.mxu0 %v1575_v38  ;;  %1592 = vmatpush.bf16.msra.mxu1 %v1575_v38  ;;  %642 = vst [vmem:[#allocation7 + $0x44] sm:$0xf] %v639_v39  ;;  %v683_v59 = vsel %vm246_vm0, %v677_v46, %v1681_v1  ;;  %v332_v60 = vunpack.c.l.bf16 %v1430_v57  ;;  %v501_v63 = vpack.c.bf16 0.0, %v499_v52  ;;  %v844_v0 = vsel %vm246_vm0, %v838_v50, %v1681_v1 }
  0x1f   : > { %1593 = vmatpush.bf16.msra.mxu2 %v1575_v38  ;;  %1594 = vmatpush.bf16.msra.mxu3 %v1575_v38  ;;  %803 = vst [vmem:[#allocation7 + $0x60] sm:$0xf] %v800_v43  ;;  %v355_v2 = vunpack.c.h.bf16 %v1430_v57  ;;  %v516_v3 = vunpack.c.l.bf16 %v1438_v61  ;;  %v662_v4 = vpack.c.bf16 0.0, %v660_v56  ;;  %v867_v6 = vsel %vm246_vm0, %v861_v53, %v1681_v1  ;;  %v1432_v38 = vld [vmem:[%s1718_s30 + $0x18] sm:$0xff]  }
  0x20   : > { %826 = vst [vmem:[#allocation7 + $0x64] sm:$0xf] %v823_v47  ;;  %v539_v7 = vunpack.c.h.bf16 %v1438_v61  ;;  %v685_v10 = vpack.c.bf16 0.0, %v683_v59  ;;  %v338_v11 = vsel %vm246_vm0, %v332_v60, %v1681_v1  ;;  %v700_v12 = vunpack.c.l.bf16 %v1446_v62  ;;  %v1456_v47 = vld [vmem:[%s1718_s30 + $0x78] sm:$0xff]  }
  0x21   : > { %297 = vst [vmem:[#allocation7 + $0x8] sm:$0xf] %v294_v51  ;;  %v846_v13 = vpack.c.bf16 0.0, %v844_v0  ;;  %v361_v14 = vsel %vm246_vm0, %v355_v2, %v1681_v1  ;;  %v723_v15 = vunpack.c.h.bf16 %v1446_v62  ;;  %v869_v16 = vpack.c.bf16 0.0, %v867_v6  ;;  %v1556_v29 = vld [vmem:[#allocation7] sm:$0xff] }
  0x22   : > { %1166 = vmatpush.bf16.msra.mxu0 %v1574_v54  ;;  %1595 = vmatpush.bf16.msra.mxu1 %v1574_v54  ;;  %320 = vst [vmem:[#allocation7 + $0xc] sm:$0xf] %v317_v55  ;;  %v522_v17 = vsel %vm246_vm0, %v516_v3, %v1681_v1  ;;  %v884_v18 = vunpack.c.l.bf16 %v1454_v8  ;;  %v340_v19 = vpack.c.bf16 0.0, %v338_v11  ;;  %v545_v20 = vsel %vm246_vm0, %v539_v7, %v1681_v1 }
  0x23   : > { %1596 = vmatpush.bf16.msra.mxu2 %v1574_v54  ;;  %1597 = vmatpush.bf16.msra.mxu3 %v1574_v54  ;;  %481 = vst [vmem:[#allocation7 + $0x28] sm:$0xf] %v478_v58  ;;  %v907_v21 = vunpack.c.h.bf16 %v1454_v8  ;;  %v363_v23 = vpack.c.bf16 0.0, %v361_v14  ;;  %v706_v24 = vsel %vm246_vm0, %v700_v12, %v1681_v1  ;;  %v524_v25 = vpack.c.bf16 0.0, %v522_v17  ;;  %v1560_v30 = vld [vmem:[#allocation7 + $0x20] sm:$0xff] }
  0x24   : > { %504 = vst [vmem:[#allocation7 + $0x2c] sm:$0xf] %v501_v63  ;;  %v729_v26 = vsel %vm246_vm0, %v723_v15, %v1681_v1  ;;  %v547_v27 = vpack.c.bf16 0.0, %v545_v20  ;;  %v890_v28 = vsel %vm246_vm0, %v884_v18, %v1681_v1  ;;  %v708_v31 = vpack.c.bf16 0.0, %v706_v24  ;;  %v1851_v15 = vld [vmem:[%s1933_s1] ss:$0 sm:$0xff] }
  0x25   : > { %665 = vst [vmem:[#allocation7 + $0x48] sm:$0xf] %v662_v4  ;;  %v913_v32 = vsel %vm246_vm0, %v907_v21, %v1681_v1  ;;  %v1564_v33 = vld [vmem:[#allocation7 + $0x40] sm:$0xff]  ;;  %v731_v35 = vpack.c.bf16 0.0, %v729_v26  ;;  %v892_v36 = vpack.c.bf16 0.0, %v890_v28  ;;  %v378_v39 = vunpack.c.l.bf16 %v1432_v38 }
  0x26   : > { %1167 = vmatpush.bf16.msra.mxu0 %v1573_v9  ;;  %1598 = vmatpush.bf16.msra.mxu1 %v1573_v9  ;;  %688 = vst [vmem:[#allocation7 + $0x4c] sm:$0xf] %v685_v10  ;;  %v915_v37 = vpack.c.bf16 0.0, %v913_v32  ;;  %v401_v40 = vunpack.c.h.bf16 %v1432_v38  ;;  %v562_v43 = vunpack.c.l.bf16 %v1440_v41  ;;  %v585_v44 = vunpack.c.h.bf16 %v1440_v41 }
  0x27   : > { %1599 = vmatpush.bf16.msra.mxu2 %v1573_v9  ;;  %1600 = vmatpush.bf16.msra.mxu3 %v1573_v9  ;;  %849 = vst [vmem:[#allocation7 + $0x68] sm:$0xf] %v846_v13  ;;  %v1568_v34 = vld [vmem:[#allocation7 + $0x60] sm:$0xff]  ;;  %v746_v45 = vunpack.c.l.bf16 %v1448_v42  ;;  %v769_v46 = vunpack.c.h.bf16 %v1448_v42  ;;  %v384_v48 = vsel %vm246_vm0, %v378_v39, %v1681_v1  ;;  %v930_v50 = vunpack.c.l.bf16 %v1456_v47 }
  0x28   : > { %872 = vst [vmem:[#allocation7 + $0x6c] sm:$0xf] %v869_v16  ;;  %v407_v49 = vsel %vm246_vm0, %v401_v40, %v1681_v1  ;;  %v953_v51 = vunpack.c.h.bf16 %v1456_v47  ;;  %v386_v52 = vpack.c.bf16 0.0, %v384_v48  ;;  %v568_v54 = vsel %vm246_vm0, %v562_v43, %v1681_v1 }
  0x29   : > { %343 = vst [vmem:[#allocation7 + $0x10] sm:$0xf] %v340_v19  ;;  %v409_v53 = vpack.c.bf16 0.0, %v407_v49  ;;  %v591_v55 = vsel %vm246_vm0, %v585_v44, %v1681_v1  ;;  %v570_v56 = vpack.c.bf16 0.0, %v568_v54  ;;  %v752_v58 = vsel %vm246_vm0, %v746_v45, %v1681_v1  ;;  %v1557_v3 = vld [vmem:[#allocation7 + $0x8] sm:$0xff] }
  0x2a   : > { %1168 = vmatpush.bf16.msra.mxu0 %v1572_v22  ;;  %1601 = vmatpush.bf16.msra.mxu1 %v1572_v22  ;;  %366 = vst [vmem:[#allocation7 + $0x14] sm:$0xf] %v363_v23  ;;  %v593_v57 = vpack.c.bf16 0.0, %v591_v55  ;;  %v775_v59 = vsel %vm246_vm0, %v769_v46, %v1681_v1  ;;  %v754_v60 = vpack.c.bf16 0.0, %v752_v58  ;;  %v936_v61 = vsel %vm246_vm0, %v930_v50, %v1681_v1 }
  0x2b   : > { %1602 = vmatpush.bf16.msra.mxu2 %v1572_v22  ;;  %1603 = vmatpush.bf16.msra.mxu3 %v1572_v22  ;;  %527 = vst [vmem:[#allocation7 + $0x30] sm:$0xf] %v524_v25  ;;  %v959_v62 = vsel %vm246_vm0, %v953_v51, %v1681_v1  ;;  %v777_v63 = vpack.c.bf16 0.0, %v775_v59  ;;  %v938_v0 = vpack.c.bf16 0.0, %v936_v61  ;;  %v1561_v4 = vld [vmem:[#allocation7 + $0x28] sm:$0xff] }
  0x2c   : > { %550 = vst [vmem:[#allocation7 + $0x34] sm:$0xf] %v547_v27  ;;  %v961_v2 = vpack.c.bf16 0.0, %v959_v62 }
  0x2d   : > { %1169 = vmatmul.bf16.vlgmr.msra.gmra.mxu0 %v1556_v29  ;;  %1189 = vmatmul.bf16.vlgmr.msra.gmra.mxu1 %v1560_v30  ;;  %711 = vst [vmem:[#allocation7 + $0x50] sm:$0xf] %v708_v31  ;;  %v1565_v6 = vld [vmem:[#allocation7 + $0x48] sm:$0xff] }
  0x2e   : > { %1209 = vmatmul.bf16.vlgmr.msra.gmra.mxu2 %v1564_v33  ;;  %1229 = vmatmul.bf16.vlgmr.msra.gmra.mxu3 %v1568_v34  ;;  %734 = vst [vmem:[#allocation7 + $0x54] sm:$0xf] %v731_v35 }
  0x2f   : > { %895 = vst [vmem:[#allocation7 + $0x70] sm:$0xf] %v892_v36  ;;  %v1569_v7 = vld [vmem:[#allocation7 + $0x68] sm:$0xff] }
  0x30   : > { %918 = vst [vmem:[#allocation7 + $0x74] sm:$0xf] %v915_v37 }
  0x31   : > { %389 = vst [vmem:[#allocation7 + $0x18] sm:$0xf] %v386_v52  ;;  %v1558_v5 = vld [vmem:[#allocation7 + $0x10] sm:$0xff] }
  0x32   : > { %412 = vst [vmem:[#allocation7 + $0x1c] sm:$0xf] %v409_v53 }
  0x33   : > { %573 = vst [vmem:[#allocation7 + $0x38] sm:$0xf] %v570_v56  ;;  %v1562_v8 = vld [vmem:[#allocation7 + $0x30] sm:$0xff] }
  0x34   : > { %596 = vst [vmem:[#allocation7 + $0x3c] sm:$0xf] %v593_v57 }
  0x35   : > { %757 = vst [vmem:[#allocation7 + $0x58] sm:$0xf] %v754_v60  ;;  %v1566_v9 = vld [vmem:[#allocation7 + $0x50] sm:$0xff] }
  0x36   : > { %780 = vst [vmem:[#allocation7 + $0x5c] sm:$0xf] %v777_v63 }
  0x37   : > { %941 = vst [vmem:[#allocation7 + $0x78] sm:$0xf] %v938_v0  ;;  %v1570_v10 = vld [vmem:[#allocation7 + $0x70] sm:$0xff] }
  0x38   : > { %964 = vst [vmem:[#allocation7 + $0x7c] sm:$0xf] %v961_v2 }
  0x39   : > { %v1559_v11 = vld [vmem:[#allocation7 + $0x18] sm:$0xff] }
  0x3b   : > { %v1563_v12 = vld [vmem:[#allocation7 + $0x38] sm:$0xff] }
  0x3d   : > { %1174 = vmatmul.bf16.gmra.mxu0 %v1557_v3  ;;  %1194 = vmatmul.bf16.gmra.mxu1 %v1561_v4  ;;  %v1567_v13 = vld [vmem:[#allocation7 + $0x58] sm:$0xff] }
  0x3e   : > { %1214 = vmatmul.bf16.gmra.mxu2 %v1565_v6  ;;  %1234 = vmatmul.bf16.gmra.mxu3 %v1569_v7 }
  0x3f   : > { %v1571_v14 = vld [vmem:[#allocation7 + $0x78] sm:$0xff] }
  0x4d   : > { %1179 = vmatmul.bf16.gmra.mxu0 %v1558_v5  ;;  %1199 = vmatmul.bf16.gmra.mxu1 %v1562_v8 }
  0x4e   : > { %1219 = vmatmul.bf16.gmra.mxu2 %v1566_v9  ;;  %1239 = vmatmul.bf16.gmra.mxu3 %v1570_v10 }
  0x5d   : > { %1184 = vmatmul.bf16.gmra.mxu0 %v1559_v11  ;;  %1204 = vmatmul.bf16.gmra.mxu1 %v1563_v12 }
  0x5e   : > { %1224 = vmatmul.bf16.gmra.mxu2 %v1567_v13  ;;  %1244 = vmatmul.bf16.gmra.mxu3 %v1571_v14 }
  0xaa   : > { %v1170_v16 = vpop.f32.mrf.mxu0  ;;  %v1190_v17 = vpop.f32.mrf.mxu1 }
  0xab   : > { %v1171_v18 = vadd.f32 %v1851_v15, %v1170_v16  ;;  %v1191_v19 = vadd.f32 %v1851_v15, %v1190_v17 }
  0xad   : > { %v1250_v20 = vmax.f32 %v1171_v18, 0.0  ;;  %v1258_v21 = vmax.f32 %v1191_v19, 0.0 }
  0xaf   : > { %1282 = vst [vmem:[%s1859_s23] sm:$0xff] %v1250_v20 }
  0xb0   : > { %1290 = vst [vmem:[%s1859_s23 + $0x40] sm:$0xff] %v1258_v21 }
  0xb1   : > { %v1210_v22 = vpop.f32.mrf.mxu2  ;;  %v1230_v23 = vpop.f32.mrf.mxu3 }
  0xb2   : > { %v1211_v24 = vadd.f32 %v1851_v15, %v1210_v22  ;;  %v1231_v25 = vadd.f32 %v1851_v15, %v1230_v23  ;;  %v1172_v26 = vpop.f32.mrf.mxu0  ;;  %v1192_v27 = vpop.f32.mrf.mxu1 }
  0xb3   : > { %v1173_v28 = vadd.f32 %v1851_v15, %v1172_v26  ;;  %v1193_v29 = vadd.f32 %v1851_v15, %v1192_v27 }
  0xb4   : > { %v1266_v30 = vmax.f32 %v1211_v24, 0.0  ;;  %v1274_v31 = vmax.f32 %v1231_v25, 0.0 }
  0xb5   : > { %v1251_v32 = vmax.f32 %v1173_v28, 0.0  ;;  %v1259_v33 = vmax.f32 %v1193_v29, 0.0 }
  0xb6   : > { %1298 = vst [vmem:[%s1859_s23 + $0x80] sm:$0xff] %v1266_v30 }
  0xb7   : > { %1306 = vst [vmem:[%s1859_s23 + $0xc0] sm:$0xff] %v1274_v31 }
  0xb8   : > { %1283 = vst [vmem:[%s1859_s23 + $0x8] sm:$0xff] %v1251_v32 }
  0xb9   : > { %1291 = vst [vmem:[%s1859_s23 + $0x48] sm:$0xff] %v1259_v33  ;;  %v1212_v34 = vpop.f32.mrf.mxu2  ;;  %v1232_v35 = vpop.f32.mrf.mxu3 }
  0xba   : > { %v1213_v36 = vadd.f32 %v1851_v15, %v1212_v34  ;;  %v1233_v37 = vadd.f32 %v1851_v15, %v1232_v35  ;;  %v1175_v38 = vpop.f32.mrf.mxu0  ;;  %v1195_v39 = vpop.f32.mrf.mxu1 }
  0xbb   : > { %v1176_v40 = vadd.f32 %v1851_v15, %v1175_v38  ;;  %v1196_v41 = vadd.f32 %v1851_v15, %v1195_v39 }
  0xbc   : > { %v1267_v42 = vmax.f32 %v1213_v36, 0.0  ;;  %v1275_v43 = vmax.f32 %v1233_v37, 0.0 }
  0xbd   : > { %v1252_v44 = vmax.f32 %v1176_v40, 0.0  ;;  %v1260_v45 = vmax.f32 %v1196_v41, 0.0 }
  0xbe   : > { %1299 = vst [vmem:[%s1859_s23 + $0x88] sm:$0xff] %v1267_v42 }
  0xbf   : > { %1307 = vst [vmem:[%s1859_s23 + $0xc8] sm:$0xff] %v1275_v43 }
  0xc0   : > { %1284 = vst [vmem:[%s1859_s23 + $0x10] sm:$0xff] %v1252_v44 }
  0xc1   : > { %1292 = vst [vmem:[%s1859_s23 + $0x50] sm:$0xff] %v1260_v45  ;;  %v1215_v46 = vpop.f32.mrf.mxu2  ;;  %v1235_v47 = vpop.f32.mrf.mxu3 }
  0xc2   : > { %v1216_v48 = vadd.f32 %v1851_v15, %v1215_v46  ;;  %v1236_v49 = vadd.f32 %v1851_v15, %v1235_v47  ;;  %v1177_v50 = vpop.f32.mrf.mxu0  ;;  %v1197_v51 = vpop.f32.mrf.mxu1 }
  0xc3   : > { %v1178_v52 = vadd.f32 %v1851_v15, %v1177_v50  ;;  %v1198_v53 = vadd.f32 %v1851_v15, %v1197_v51 }
  0xc4   : > { %v1268_v54 = vmax.f32 %v1216_v48, 0.0  ;;  %v1276_v55 = vmax.f32 %v1236_v49, 0.0 }
  0xc5   : > { %v1253_v56 = vmax.f32 %v1178_v52, 0.0  ;;  %v1261_v57 = vmax.f32 %v1198_v53, 0.0 }
  0xc6   : > { %1300 = vst [vmem:[%s1859_s23 + $0x90] sm:$0xff] %v1268_v54 }
  0xc7   : > { %1308 = vst [vmem:[%s1859_s23 + $0xd0] sm:$0xff] %v1276_v55 }
  0xc8   : > { %1285 = vst [vmem:[%s1859_s23 + $0x18] sm:$0xff] %v1253_v56 }
  0xc9   : > { %1293 = vst [vmem:[%s1859_s23 + $0x58] sm:$0xff] %v1261_v57  ;;  %v1217_v58 = vpop.f32.mrf.mxu2  ;;  %v1237_v59 = vpop.f32.mrf.mxu3 }
  0xca   : > { %v1218_v60 = vadd.f32 %v1851_v15, %v1217_v58  ;;  %v1238_v61 = vadd.f32 %v1851_v15, %v1237_v59  ;;  %v1180_v62 = vpop.f32.mrf.mxu0  ;;  %v1200_v63 = vpop.f32.mrf.mxu1 }
  0xcb   : > { %v1181_v0 = vadd.f32 %v1851_v15, %v1180_v62  ;;  %v1201_v2 = vadd.f32 %v1851_v15, %v1200_v63 }
  0xcc   : > { %v1269_v3 = vmax.f32 %v1218_v60, 0.0  ;;  %v1277_v4 = vmax.f32 %v1238_v61, 0.0 }
  0xcd   : > { %v1254_v6 = vmax.f32 %v1181_v0, 0.0  ;;  %v1262_v7 = vmax.f32 %v1201_v2, 0.0 }
  0xce   : > { %1301 = vst [vmem:[%s1859_s23 + $0x98] sm:$0xff] %v1269_v3 }
  0xcf   : > { %1309 = vst [vmem:[%s1859_s23 + $0xd8] sm:$0xff] %v1277_v4 }
  0xd0   : > { %1286 = vst [vmem:[%s1859_s23 + $0x20] sm:$0xff] %v1254_v6 }
  0xd1   : > { %1294 = vst [vmem:[%s1859_s23 + $0x60] sm:$0xff] %v1262_v7  ;;  %v1220_v5 = vpop.f32.mrf.mxu2  ;;  %v1240_v8 = vpop.f32.mrf.mxu3 }
  0xd2   : > { %v1221_v9 = vadd.f32 %v1851_v15, %v1220_v5  ;;  %v1241_v10 = vadd.f32 %v1851_v15, %v1240_v8  ;;  %v1182_v11 = vpop.f32.mrf.mxu0  ;;  %v1202_v12 = vpop.f32.mrf.mxu1 }
  0xd3   : > { %v1183_v13 = vadd.f32 %v1851_v15, %v1182_v11  ;;  %v1203_v14 = vadd.f32 %v1851_v15, %v1202_v12 }
  0xd4   : > { %v1270_v16 = vmax.f32 %v1221_v9, 0.0  ;;  %v1278_v17 = vmax.f32 %v1241_v10, 0.0 }
  0xd5   : > { %v1255_v18 = vmax.f32 %v1183_v13, 0.0  ;;  %v1263_v19 = vmax.f32 %v1203_v14, 0.0 }
  0xd6   : > { %1302 = vst [vmem:[%s1859_s23 + $0xa0] sm:$0xff] %v1270_v16 }
  0xd7   : > { %1310 = vst [vmem:[%s1859_s23 + $0xe0] sm:$0xff] %v1278_v17 }
  0xd8   : > { %1287 = vst [vmem:[%s1859_s23 + $0x28] sm:$0xff] %v1255_v18 }
  0xd9   : > { %1295 = vst [vmem:[%s1859_s23 + $0x68] sm:$0xff] %v1263_v19  ;;  %v1222_v20 = vpop.f32.mrf.mxu2  ;;  %v1242_v21 = vpop.f32.mrf.mxu3 }
  0xda   : > { %v1223_v22 = vadd.f32 %v1851_v15, %v1222_v20  ;;  %v1243_v23 = vadd.f32 %v1851_v15, %v1242_v21  ;;  %v1185_v24 = vpop.f32.mrf.mxu0  ;;  %v1205_v25 = vpop.f32.mrf.mxu1 }
  0xdb   : > { %v1186_v26 = vadd.f32 %v1851_v15, %v1185_v24  ;;  %v1206_v27 = vadd.f32 %v1851_v15, %v1205_v25 }
  0xdc   : > { %v1271_v28 = vmax.f32 %v1223_v22, 0.0  ;;  %v1279_v29 = vmax.f32 %v1243_v23, 0.0 }
  0xdd   : > { %v1256_v30 = vmax.f32 %v1186_v26, 0.0  ;;  %v1264_v31 = vmax.f32 %v1206_v27, 0.0 }
  0xde   : > { %1303 = vst [vmem:[%s1859_s23 + $0xa8] sm:$0xff] %v1271_v28 }
  0xdf   : > { %1311 = vst [vmem:[%s1859_s23 + $0xe8] sm:$0xff] %v1279_v29 }
  0xe0   : > { %1288 = vst [vmem:[%s1859_s23 + $0x30] sm:$0xff] %v1256_v30 }
  0xe1   : > { %1296 = vst [vmem:[%s1859_s23 + $0x70] sm:$0xff] %v1264_v31  ;;  %v1225_v32 = vpop.f32.mrf.mxu2  ;;  %v1245_v33 = vpop.f32.mrf.mxu3 }
  0xe2   : > { %v1226_v34 = vadd.f32 %v1851_v15, %v1225_v32  ;;  %v1246_v35 = vadd.f32 %v1851_v15, %v1245_v33  ;;  %v1187_v36 = vpop.f32.mrf.mxu0  ;;  %v1207_v37 = vpop.f32.mrf.mxu1 }
  0xe3   : > { %v1188_v38 = vadd.f32 %v1851_v15, %v1187_v36  ;;  %v1208_v39 = vadd.f32 %v1851_v15, %v1207_v37 }
  0xe4   : > { %v1272_v40 = vmax.f32 %v1226_v34, 0.0  ;;  %v1280_v41 = vmax.f32 %v1246_v35, 0.0 }
  0xe5   : > { %v1257_v42 = vmax.f32 %v1188_v38, 0.0  ;;  %v1265_v43 = vmax.f32 %v1208_v39, 0.0 }
  0xe6   : > { %1304 = vst [vmem:[%s1859_s23 + $0xb0] sm:$0xff] %v1272_v40 }
  0xe7   : > { %1312 = vst [vmem:[%s1859_s23 + $0xf0] sm:$0xff] %v1280_v41 }
  0xe8   : > { %1289 = vst [vmem:[%s1859_s23 + $0x38] sm:$0xff] %v1257_v42 }
  0xe9   : > { %1297 = vst [vmem:[%s1859_s23 + $0x78] sm:$0xff] %v1265_v43  ;;  %v1227_v44 = vpop.f32.mrf.mxu2  ;;  %v1247_v45 = vpop.f32.mrf.mxu3 }
  0xea   : > { %v1228_v46 = vadd.f32 %v1851_v15, %v1227_v44  ;;  %v1248_v47 = vadd.f32 %v1851_v15, %v1247_v45 }
  0xec   : > { %v1273_v48 = vmax.f32 %v1228_v46, 0.0  ;;  %v1281_v49 = vmax.f32 %v1248_v47, 0.0 }
  0xee   : > { %1305 = vst [vmem:[%s1859_s23 + $0xb8] sm:$0xff] %v1273_v48 }
  0xef   : > { %1313 = vst [vmem:[%s1859_s23 + $0xf8] sm:$0xff] %v1281_v49 }
  0xf0 PF: > { %s19_s19 = sadd.s32 1, %s1651_s19   ;;  %s1937_s17 = smov %s1647_s18 }
  0xf1   : > { %p16_p5 = scmp.ge.s32.totalorder %s19_s19, 4   ;;  %s1938_s18 = smov %s1940_s3 }
  0xf3   :  { %18 = sbr.rel (!%p16_p5) target bundleno = 3 (0x3), region = 130 }

</bundles_post_ra>
